<compile_context>
chip_gen: v7x
topology: tpu7x:2x2x1
jax: 0.10.0
libtpu: 0.0.40
codegen_flags: <defaults>
</compile_context>

<pallas_src>
import jax
import jax.numpy as jnp
from jax.experimental import pallas as pl
from jax.experimental.pallas import tpu as pltpu

DROPOUT_P = 0.5


def _round_up(n, m):
    return ((n + m - 1) // m) * m


def _fused_dropout_mask(key, shape, p):
    """Pre-scaled mask equivalent to two back-to-back inverted dropouts."""
    if p <= 0.0:
        return jnp.ones(shape, jnp.float32)
    keep_p = (1.0 - p) ** 2
    keep = jax.random.bernoulli(key, keep_p, shape)
    return keep.astype(jnp.float32) * (1.0 / keep_p)


def prenet_kernel(x_ref, w1_ref, b1_ref, w2_ref, b2_ref, m1_ref, m2_ref, o_ref):
    # layer 0: Linear -> dropout -> ReLU -> dropout  (dropouts fused into m1)
    h = jnp.dot(x_ref[...], w1_ref[...], preferred_element_type=jnp.float32)
    h = jnp.maximum(h + b1_ref[...], 0.0) * m1_ref[...]

    # layer 1: Linear -> dropout -> ReLU -> dropout  (dropouts fused into m2)
    h2 = jnp.dot(h.astype(w2_ref.dtype), w2_ref[...],
                 preferred_element_type=jnp.float32)
    h2 = jnp.maximum(h2 + b2_ref[...], 0.0) * m2_ref[...]

    o_ref[...] = h2.astype(o_ref.dtype)


def prenet_forward(x, params, dropout_key, p=DROPOUT_P, tile_b=512):
    """x: (B, in_dim) f32.  params: dict with w1,b1,w2,b2 in PyTorch layout."""
    B, in_dim = x.shape
    hidden = params["w1"].shape[0]

    # ---- pad to TPU-friendly shapes (lanes multiple of 128, rows of 8) ----
    in_p = _round_up(in_dim, 128)
    h_p = _round_up(hidden, 128)
    tile_b = min(tile_b, _round_up(B, 8))   # small batches: one tile
    b_p = _round_up(B, tile_b)

    # Pre-transposed weights (x @ W layout), bf16 for the MXU; biases f32.
    x_p = jnp.zeros((b_p, in_p), jnp.bfloat16).at[:B, :in_dim].set(
        x.astype(jnp.bfloat16))
    w1t = jnp.zeros((in_p, h_p), jnp.bfloat16).at[:in_dim, :hidden].set(
        params["w1"].T.astype(jnp.bfloat16))
    w2t = jnp.zeros((h_p, h_p), jnp.bfloat16).at[:hidden, :hidden].set(
        params["w2"].T.astype(jnp.bfloat16))
    b1 = jnp.zeros((1, h_p), jnp.float32).at[:, :hidden].set(
        params["b1"].astype(jnp.float32)[None, :])
    b2 = jnp.zeros((1, h_p), jnp.float32).at[:, :hidden].set(
        params["b2"].astype(jnp.float32)[None, :])

    # Per-layer fused dropout masks (distinct rows per batch tile by design).
    k1, k2 = jax.random.split(dropout_key)
    m1 = _fused_dropout_mask(k1, (b_p, h_p), p)
    m2 = _fused_dropout_mask(k2, (b_p, h_p), p)

    grid = (b_p // tile_b,)

    out = pl.pallas_call(
        prenet_kernel,
        out_shape=jax.ShapeDtypeStruct((b_p, h_p), jnp.float32),
        grid=grid,
        in_specs=[
            pl.BlockSpec((tile_b, in_p), lambda i: (i, 0)),   # x tile
            pl.BlockSpec((in_p, h_p), lambda i: (0, 0)),      # w1 (resident)
            pl.BlockSpec((1, h_p), lambda i: (0, 0)),         # b1 (resident)
            pl.BlockSpec((h_p, h_p), lambda i: (0, 0)),       # w2 (resident)
            pl.BlockSpec((1, h_p), lambda i: (0, 0)),         # b2 (resident)
            pl.BlockSpec((tile_b, h_p), lambda i: (i, 0)),    # mask layer 0
            pl.BlockSpec((tile_b, h_p), lambda i: (i, 0)),    # mask layer 1
        ],
        out_specs=pl.BlockSpec((tile_b, h_p), lambda i: (i, 0)),
        compiler_params=pltpu.CompilerParams(
            dimension_semantics=("parallel",),   # shard batch tiles across TCs
        ),
    )(x_p, w1t, b1, w2t, b2, m1, m2)

    return out[:B, :hidden]


def init_params(key, in_dim, hidden_dim):
    """Deterministic synthetic init (PyTorch Linear weight layout: (out, in))."""
    k1, k2, k3, k4 = jax.random.split(key, 4)
    bound1 = 1.0 / jnp.sqrt(in_dim)
    bound2 = 1.0 / jnp.sqrt(hidden_dim)
    return {
        "w1": jax.random.uniform(k1, (hidden_dim, in_dim), jnp.float32, -bound1, bound1),
        "b1": jax.random.uniform(k2, (hidden_dim,), jnp.float32, -bound1, bound1),
        "w2": jax.random.uniform(k3, (hidden_dim, hidden_dim), jnp.float32, -bound2, bound2),
        "b2": jax.random.uniform(k4, (hidden_dim,), jnp.float32, -bound2, bound2),
    }


if __name__ == "__main__":
    key = jax.random.PRNGKey(0)
    kx, kp, kd = jax.random.split(key, 3)

    B, IN_DIM, HIDDEN = 8, 16, 32
    x = jax.random.normal(kx, (B, IN_DIM), dtype=jnp.float32)
    params = init_params(kp, IN_DIM, HIDDEN)

    out = prenet_forward(x, params, dropout_key=kd)
    out = jax.block_until_ready(out)

    assert out.shape == (B, HIDDEN), out.shape
    assert out.dtype == jnp.float32, out.dtype
    assert bool(jnp.all(jnp.isfinite(out)))
    print("KERNEL_OK")
</pallas_src>

<mosaic_0001>
module attributes {stable_mosaic.version = 11 : i64} {
  func.func @prenet_kernel(%arg0: i32, %arg1: memref<8x128xbf16, #tpu.memory_space<vmem>>, %arg2: memref<128x128xbf16, #tpu.memory_space<vmem>>, %arg3: memref<1x128xf32, #tpu.memory_space<vmem>>, %arg4: memref<128x128xbf16, #tpu.memory_space<vmem>>, %arg5: memref<1x128xf32, #tpu.memory_space<vmem>>, %arg6: memref<8x128xf32, #tpu.memory_space<vmem>>, %arg7: memref<8x128xf32, #tpu.memory_space<vmem>>, %arg8: memref<8x128xf32, #tpu.memory_space<vmem>>) attributes {dimension_semantics = [#tpu.dimension_semantics<parallel>], iteration_bounds = array<i64: 1>, scalar_prefetch = 0 : i64, scratch_operands = 0 : i64, tpu.core_type = #tpu.core_type<tc>, window_params = [{transform_indices = @transform_0, window_bounds = array<i64: 8, 128>}, {pipeline_mode = #tpu.pipeline_mode<synchronous>, transform_indices = @transform_1, window_bounds = array<i64: 128, 128>}, {pipeline_mode = #tpu.pipeline_mode<synchronous>, transform_indices = @transform_2, window_bounds = array<i64: 1, 128>}, {pipeline_mode = #tpu.pipeline_mode<synchronous>, transform_indices = @transform_3, window_bounds = array<i64: 128, 128>}, {pipeline_mode = #tpu.pipeline_mode<synchronous>, transform_indices = @transform_4, window_bounds = array<i64: 1, 128>}, {transform_indices = @transform_5, window_bounds = array<i64: 8, 128>}, {transform_indices = @transform_6, window_bounds = array<i64: 8, 128>}, {transform_indices = @transform_7, window_bounds = array<i64: 8, 128>}]} {
    %c0 = arith.constant 0 : index
    %c0_0 = arith.constant 0 : index
    %0 = vector.load %arg1[%c0, %c0_0] : memref<8x128xbf16, #tpu.memory_space<vmem>>, vector<8x128xbf16>
    %c0_1 = arith.constant 0 : index
    %c0_2 = arith.constant 0 : index
    %1 = vector.load %arg2[%c0_1, %c0_2] : memref<128x128xbf16, #tpu.memory_space<vmem>>, vector<128x128xbf16>
    %cst = arith.constant dense<0.000000e+00> : vector<8x128xf32>
    %2 = tpu.matmul %0, %1, %cst {dimension_numbers = #tpu.dot_dimension_numbers<[1], [0], [0], [1], [0, 0, 1, 1], [], []>} : vector<8x128xbf16>, vector<128x128xbf16>, vector<8x128xf32> -> vector<8x128xf32>
    %c0_3 = arith.constant 0 : index
    %c0_4 = arith.constant 0 : index
    %3 = vector.load %arg3[%c0_3, %c0_4] : memref<1x128xf32, #tpu.memory_space<vmem>>, vector<1x128xf32>
    %4 = vector.broadcast %3 : vector<1x128xf32> to vector<8x128xf32>
    %5 = arith.addf %2, %4 : vector<8x128xf32>
    %cst_5 = arith.constant 0.000000e+00 : f32
    %6 = vector.broadcast %cst_5 : f32 to vector<8x128xf32>
    %7 = arith.maximumf %5, %6 : vector<8x128xf32>
    %c0_6 = arith.constant 0 : index
    %c0_7 = arith.constant 0 : index
    %8 = vector.load %arg6[%c0_6, %c0_7] : memref<8x128xf32, #tpu.memory_space<vmem>>, vector<8x128xf32>
    %9 = arith.mulf %7, %8 : vector<8x128xf32>
    %10 = arith.truncf %9 : vector<8x128xf32> to vector<8x128xbf16>
    %c0_8 = arith.constant 0 : index
    %c0_9 = arith.constant 0 : index
    %11 = vector.load %arg4[%c0_8, %c0_9] : memref<128x128xbf16, #tpu.memory_space<vmem>>, vector<128x128xbf16>
    %cst_10 = arith.constant dense<0.000000e+00> : vector<8x128xf32>
    %12 = tpu.matmul %10, %11, %cst_10 {dimension_numbers = #tpu.dot_dimension_numbers<[1], [0], [0], [1], [0, 0, 1, 1], [], []>} : vector<8x128xbf16>, vector<128x128xbf16>, vector<8x128xf32> -> vector<8x128xf32>
    %c0_11 = arith.constant 0 : index
    %c0_12 = arith.constant 0 : index
    %13 = vector.load %arg5[%c0_11, %c0_12] : memref<1x128xf32, #tpu.memory_space<vmem>>, vector<1x128xf32>
    %14 = vector.broadcast %13 : vector<1x128xf32> to vector<8x128xf32>
    %15 = arith.addf %12, %14 : vector<8x128xf32>
    %cst_13 = arith.constant 0.000000e+00 : f32
    %16 = vector.broadcast %cst_13 : f32 to vector<8x128xf32>
    %17 = arith.maximumf %15, %16 : vector<8x128xf32>
    %c0_14 = arith.constant 0 : index
    %c0_15 = arith.constant 0 : index
    %18 = vector.load %arg7[%c0_14, %c0_15] : memref<8x128xf32, #tpu.memory_space<vmem>>, vector<8x128xf32>
    %19 = arith.mulf %17, %18 : vector<8x128xf32>
    %c0_16 = arith.constant 0 : index
    %c0_17 = arith.constant 0 : index
    %20 = vector.load %arg8[%c0_16, %c0_17] : memref<8x128xf32, #tpu.memory_space<vmem>>, vector<8x128xf32>
    tpu.vector_store %arg8[%c0_16, %c0_17], %19 {strides = array<i32>} : memref<8x128xf32, #tpu.memory_space<vmem>>, vector<8x128xf32>,
    return
  }
  func.func @transform_0(%arg0: i32) -> (i32, i32) {
    %c0_i32 = arith.constant 0 : i32
    %c0_i32_0 = arith.constant 0 : i32
    return %arg0, %c0_i32 : i32, i32
  }
  func.func @transform_1(%arg0: i32) -> (i32, i32) {
    %c0_i32 = arith.constant 0 : i32
    %c0_i32_0 = arith.constant 0 : i32
    %c0_i32_1 = arith.constant 0 : i32
    return %c0_i32, %c0_i32_0 : i32, i32
  }
  func.func @transform_2(%arg0: i32) -> (i32, i32) {
    %c0_i32 = arith.constant 0 : i32
    %c0_i32_0 = arith.constant 0 : i32
    %c0_i32_1 = arith.constant 0 : i32
    return %c0_i32, %c0_i32_0 : i32, i32
  }
  func.func @transform_3(%arg0: i32) -> (i32, i32) {
    %c0_i32 = arith.constant 0 : i32
    %c0_i32_0 = arith.constant 0 : i32
    %c0_i32_1 = arith.constant 0 : i32
    return %c0_i32, %c0_i32_0 : i32, i32
  }
  func.func @transform_4(%arg0: i32) -> (i32, i32) {
    %c0_i32 = arith.constant 0 : i32
    %c0_i32_0 = arith.constant 0 : i32
    %c0_i32_1 = arith.constant 0 : i32
    return %c0_i32, %c0_i32_0 : i32, i32
  }
  func.func @transform_5(%arg0: i32) -> (i32, i32) {
    %c0_i32 = arith.constant 0 : i32
    %c0_i32_0 = arith.constant 0 : i32
    return %arg0, %c0_i32 : i32, i32
  }
  func.func @transform_6(%arg0: i32) -> (i32, i32) {
    %c0_i32 = arith.constant 0 : i32
    %c0_i32_0 = arith.constant 0 : i32
    return %arg0, %c0_i32 : i32, i32
  }
  func.func @transform_7(%arg0: i32) -> (i32, i32) {
    %c0_i32 = arith.constant 0 : i32
    %c0_i32_0 = arith.constant 0 : i32
    return %arg0, %c0_i32 : i32, i32
  }
}

</mosaic_0001>

<bundles_post_ra>
// kernel: tpu_custom_call.1
= control target key start
LH: loop header
LB: loop body
LE: loop exit
PB: predicated region body
PF: predicated region fallthrough
CT: control target
= control target key end

     0   :  { %12 = vsyncpa [#allocation3], 0  ;;  %s622_s0 = inlined_call_operand.hbm [shape: bf16[8,128], index: 0, kind: input, shape index: {}]   ;;  %s623_s1 = inlined_call_operand.hbm [shape: bf16[128,128], index: 1, kind: input, shape index: {}]   ;;  %s624_s2 = inlined_call_operand.vmem [shape: f32[1,128], index: 2, kind: input, shape index: {}]   ;;  %s625_s3 = inlined_call_operand.hbm [shape: bf16[128,128], index: 3, kind: input, shape index: {}]   ;;  %s626_s4 = inlined_call_operand.vmem [shape: f32[1,128], index: 4, kind: input, shape index: {}]   ;;  %s627_s5 = inlined_call_operand.vmem [shape: f32[8,128], index: 5, kind: input, shape index: {}]   ;;  %s628_s6 = inlined_call_operand.vmem [shape: f32[8,128], index: 6, kind: input, shape index: {}]   ;;  %s629_s7 = inlined_call_operand.hbm [shape: f32[8,128], index: 7, kind: output, shape index: {}]  }
   0x1   :  { %13 = vsyncpa [#allocation6], 0 }
   0x2   :  { %14 = vsyncpa [#allocation4], 0  ;;  %s508_s24 = smov [#allocation5]   ;;  %s414_s28 = scalar_lea.hbm %s623_s1, 1024 }
   0x3   :  { %s30_s25 = sshll.u32 %s508_s24, 4  ;;  %p415_p0 = scmp.ne.s32.totalorder %s623_s1, %s414_s28  ;;  %s31_s25 = int_to_ptr.vmem [resolvable:$true] %s30_s25 }
   0x4   :  { %p418_p1 = scmp.lt.u32.totalorder %s414_s28, %s623_s1 }
   0x6   :  { %p420_p2 = pnand %p418_p1, %p415_p0 }
   0x8   :  { %423 = shalt.err (!%p420_p2)
}
   0x9   :  { %s424_s10 = scalar_lea.vmem %s31_s25, 1024  ;;  %p429_p4 = scmp.lt.s32.totalorder %s31_s25, %s31_s25 }
   0xa   :  { %p425_p3 = scmp.ne.s32.totalorder %s31_s25, %s424_s10  ;;  %p430_p5 = scmp.lt.s32.totalorder %s424_s10, %s424_s10 }
   0xc   :  { %p431_p6 = por %p430_p5, %p429_p4 }
   0xe   :  { %p432_p7 = pnand %p431_p6, %p425_p3 }
  0x10   :  { %435 = shalt.err (!%p432_p7)
}
  0x11   :  { %s509_s11 = smov 64   ;;  %s510_s12 = smov 4  }
  0x12   :  { %36 = dma.hbm_to_vmem [thread:$0]  %s623_s1, 1024, %s31_s25, [#allocation6], %s509_s11, %s509_s11, %s510_s12  }
  0x13   :  { %s511_s15 = smov [#allocation2]   ;;  %s512_s17 = smov [#allocation7]  }
  0x14   :  { %s21_s16 = sshll.u32 %s511_s15, 4  ;;  %s44_s18 = sshll.u32 %s512_s17, 4  ;;  %s22_s16 = int_to_ptr.vmem [resolvable:$true] %s21_s16  ;;  %s45_s18 = int_to_ptr.vmem [resolvable:$true] %s44_s18 }
  0x15   :  { %s436_s21 = scalar_lea.hbm %s622_s0, 64 }
  0x16   :  { %p437_p8 = scmp.ne.s32.totalorder %s622_s0, %s436_s21  ;;  %p440_p9 = scmp.lt.u32.totalorder %s436_s21, %s622_s0 }
  0x18   :  { %p442_p10 = pnand %p440_p9, %p437_p8 }
  0x1a   :  { %445 = shalt.err (!%p442_p10)
}
  0x1b   :  { %s446_s1 = scalar_lea.vmem %s22_s16, 64  ;;  %p451_p12 = scmp.lt.s32.totalorder %s22_s16, %s22_s16 }
  0x1c   :  { %p447_p11 = scmp.ne.s32.totalorder %s22_s16, %s446_s1  ;;  %p452_p13 = scmp.lt.s32.totalorder %s446_s1, %s446_s1 }
  0x1e   :  { %p453_p0 = por %p452_p13, %p451_p12 }
  0x20   :  { %p454_p1 = pnand %p453_p0, %p447_p11 }
  0x22   :  { %457 = shalt.err (!%p454_p1)
}
  0x23   :  { %24 = dma.hbm_to_vmem [thread:$0]  %s622_s0, 64, %s22_s16, [#allocation3]  }
  0x24   :  { %s458_s30 = scalar_lea.hbm %s625_s3, 1024 }
  0x25   :  { %p459_p2 = scmp.ne.s32.totalorder %s625_s3, %s458_s30  ;;  %p462_p3 = scmp.lt.u32.totalorder %s458_s30, %s625_s3 }
  0x27   :  { %p464_p4 = pnand %p462_p3, %p459_p2 }
  0x29   :  { %467 = shalt.err (!%p464_p4)
}
  0x2a   :  { %s468_s14 = scalar_lea.vmem %s45_s18, 1024  ;;  %p473_p6 = scmp.lt.s32.totalorder %s45_s18, %s45_s18 }
  0x2b   :  { %p469_p5 = scmp.ne.s32.totalorder %s45_s18, %s468_s14  ;;  %p474_p7 = scmp.lt.s32.totalorder %s468_s14, %s468_s14 }
  0x2d   :  { %p475_p8 = por %p474_p7, %p473_p6 }
  0x2f   :  { %p476_p9 = pnand %p475_p8, %p469_p5 }
  0x31   :  { %479 = shalt.err (!%p476_p9)
}
  0x32   :  { %50 = dma.hbm_to_vmem [thread:$0]  %s625_s3, 1024, %s45_s18, [#allocation6], %s509_s11, %s509_s11, %s510_s12  }
  0x33   :  { %502 = dma.done.wait [#allocation3], 64  }
  0x34   :  { %503 = vsyncadd [#allocation3], 4294967232 }
  0x35   :  { %504 = dma.done.wait [#allocation6], 2048  }
  0x36   :  { %505 = vsyncadd [#allocation6], 4294965248  ;;  %v513_v0 = vmov 0.0   ;;  %vm514_vm0 = vmmov 0   ;;  %v398_v1 = vld [vmem:[#allocation5] sm:$0xff]   ;;  %v399_v2 = vld [vmem:[#allocation5 + $0x8] sm:$0xff]  }
  0x37   :  { %350 = vmatprep.subr.bf16.mxu0 %v513_v0  ;;  %366 = vmatprep.mubr.msk.bf16.mxu0 %vm514_vm0, %v513_v0  ;;  %v400_v3 = vld [vmem:[#allocation5 + $0x10] sm:$0xff]   ;;  %v406_v4 = vld [vmem:[#allocation7] sm:$0xff]   ;;  %v401_v5 = vld [vmem:[#allocation5 + $0x18] sm:$0xff]   ;;  %s515_s20 = smov [#allocation8]  }
  0x38   :  { %370 = vmatprep.subr.bf16.mxu1 %v513_v0  ;;  %386 = vmatprep.mubr.msk.bf16.mxu1 %vm514_vm0, %v513_v0  ;;  %v407_v6 = vld [vmem:[#allocation7 + $0x8] sm:$0xff]   ;;  %v402_v7 = vld [vmem:[#allocation5 + $0x20] sm:$0xff]   ;;  %v408_v8 = vld [vmem:[#allocation7 + $0x10] sm:$0xff]  }
  0x39   :  { %351 = vmatpush3.bf16.msra.mxu0 %v398_v1  ;;  %371 = vmatpush3.bf16.msra.mxu1 %v406_v4  ;;  %v403_v9 = vld [vmem:[#allocation5 + $0x28] sm:$0xff]   ;;  %v409_v10 = vld [vmem:[#allocation7 + $0x18] sm:$0xff]   ;;  %v404_v11 = vld [vmem:[#allocation5 + $0x30] sm:$0xff]  }
  0x3a   :  { %352 = vmatprep.subr.bf16.mxu0 %v513_v0  ;;  %372 = vmatprep.subr.bf16.mxu1 %v513_v0  ;;  %v410_v12 = vld [vmem:[#allocation7 + $0x20] sm:$0xff]   ;;  %v405_v13 = vld [vmem:[#allocation5 + $0x38] sm:$0xff]   ;;  %v411_v14 = vld [vmem:[#allocation7 + $0x28] sm:$0xff]  }
  0x3b   :  { %v67_v15 = vld [vmem:[#allocation2] sm:$0xf]  ;;  %v412_v16 = vld [vmem:[#allocation7 + $0x30] sm:$0xff]   ;;  %v314_v18 = vld [vmem:[%s624_s2] ss:$0 sm:$0xff] }
  0x3c   :  { %v413_v17 = vld [vmem:[#allocation7 + $0x38] sm:$0xff]   ;;  %v180_v22 = vld [vmem:[%s627_s5] sm:$0xff]  ;;  %s304_s5 = sshll.u32 %s515_s20, 4  ;;  %s305_s5 = int_to_ptr.vmem [resolvable:$true] %s304_s5 }
  0x3d   :  { %353 = vmatpush3.bf16.msra.mxu0 %v399_v2  ;;  %373 = vmatpush3.bf16.msra.mxu1 %v407_v6  ;;  %v323_v28 = vld [vmem:[%s626_s4] ss:$0 sm:$0xff]  ;;  %s480_s21 = scalar_lea.vmem %s305_s5, 128  ;;  %p485_p11 = scmp.lt.s32.totalorder %s305_s5, %s305_s5 }
  0x3e   :  { %354 = vmatprep.subr.bf16.mxu0 %v513_v0  ;;  %374 = vmatprep.subr.bf16.mxu1 %v513_v0  ;;  %v295_v32 = vld [vmem:[%s628_s6] sm:$0xff]  ;;  %p481_p10 = scmp.ne.s32.totalorder %s305_s5, %s480_s21  ;;  %p486_p12 = scmp.lt.s32.totalorder %s480_s21, %s480_s21 }
  0x40   :  { %p487_p13 = por %p486_p12, %p485_p11 }
  0x41   :  { %355 = vmatpush3.bf16.msra.mxu0 %v400_v3  ;;  %375 = vmatpush3.bf16.msra.mxu1 %v408_v8 }
  0x42   :  { %356 = vmatprep.subr.bf16.mxu0 %v513_v0  ;;  %376 = vmatprep.subr.bf16.mxu1 %v513_v0  ;;  %p488_p0 = pnand %p487_p13, %p481_p10 }
  0x45   :  { %357 = vmatpush3.bf16.msra.mxu0 %v401_v5  ;;  %377 = vmatpush3.bf16.msra.mxu1 %v409_v10 }
  0x46   :  { %358 = vmatprep.subr.bf16.mxu0 %v513_v0  ;;  %378 = vmatprep.subr.bf16.mxu1 %v513_v0 }
  0x49   :  { %359 = vmatpush3.bf16.msra.mxu0 %v402_v7  ;;  %379 = vmatpush3.bf16.msra.mxu1 %v410_v12 }
  0x4a   :  { %360 = vmatprep.subr.bf16.mxu0 %v513_v0  ;;  %380 = vmatprep.subr.bf16.mxu1 %v513_v0 }
  0x4d   :  { %361 = vmatpush3.bf16.msra.mxu0 %v403_v9  ;;  %381 = vmatpush3.bf16.msra.mxu1 %v411_v14 }
  0x4e   :  { %362 = vmatprep.subr.bf16.mxu0 %v513_v0  ;;  %382 = vmatprep.subr.bf16.mxu1 %v513_v0 }
  0x51   :  { %363 = vmatpush3.bf16.msra.mxu0 %v404_v11  ;;  %383 = vmatpush3.bf16.msra.mxu1 %v412_v16 }
  0x52   :  { %364 = vmatprep.subr.bf16.mxu0 %v513_v0  ;;  %384 = vmatprep.subr.bf16.mxu1 %v513_v0 }
  0x55   :  { %365 = vmatpush3.bf16.msra.mxu0 %v405_v13  ;;  %385 = vmatpush3.bf16.msra.mxu1 %v413_v17 }
  0x58   :  { %367 = vmatmul.mubr.bf16.vlgmr.msra.gmra.mrb[0].mxu0 %v67_v15 }
 0x12b   :  { %v173_v19 = vpop.f32.mrb[0].mxu0 }
 0x12c   :  { %v174_v20 = vadd.f32 %v314_v18, %v173_v19  ;;  %v368_v21 = vpop.f32.mrb[1].mxu0 }
 0x12d   :  { %v176_v23 = vpop.f32.mrb[2].mxu0 }
 0x12e   :  { %v179_v24 = vmax.f32 %v174_v20, 0.0  ;;  %v369_v25 = vpop.f32.mrb[3].mxu0 }
 0x130   :  { %v181_v26 = vmul.f32 %v180_v22, %v179_v24 }
 0x132   :  { %v182_v27 = vpack.c.bf16 %v181_v26, %v181_v26 }
 0x134   :  { %387 = vmatmul.mubr.bf16.vlgmr.msra.gmra.mrb[0].mxu1 %v182_v27 }
 0x207   :  { %v288_v29 = vpop.f32.mrb[0].mxu1 }
 0x208   :  { %v289_v30 = vadd.f32 %v323_v28, %v288_v29  ;;  %v388_v31 = vpop.f32.mrb[1].mxu1 }
 0x209   :  { %v291_v33 = vpop.f32.mrb[2].mxu1 }
 0x20a   :  { %v294_v34 = vmax.f32 %v289_v30, 0.0  ;;  %v389_v35 = vpop.f32.mrb[3].mxu1 }
 0x20c   :  { %v296_v36 = vmul.f32 %v295_v32, %v294_v34 }
 0x20e   :  { %297 = vst [vmem:[#allocation8] sm:$0xff] %v296_v36 }
 0x20f   :  { %491 = shalt.err (!%p488_p0)
}
 0x210   :  { %s492_s23 = scalar_lea.hbm %s629_s7, 128 }
 0x211   :  { %p493_p1 = scmp.ne.s32.totalorder %s629_s7, %s492_s23  ;;  %p496_p2 = scmp.lt.u32.totalorder %s492_s23, %s629_s7 }
 0x213   :  { %p498_p3 = pnand %p496_p2, %p493_p1 }
 0x215   :  { %501 = shalt.err (!%p498_p3)
}
 0x216   :  { %307 = dma.vmem_to_hbm [thread:$0]  %s305_s5, 128, %s629_s7, [#allocation4]  }
 0x217   :  { %506 = dma.done.wait [#allocation4], 128  }
 0x218   :  { %507 = vsyncadd [#allocation4], 4294967168 }
 0x219   :  { %311 = vsyncpa [#allocation3], 1 }
 0x21a   :  { %312 = vsyncpa [#allocation6], 1 }
 0x21b   :  { %313 = vsyncpa [#allocation4], 1 }

</bundles_post_ra>
